<compile_context>
chip_gen: v6e
topology: v6e:2x2x1
jax: 0.10.0
libtpu: 0.0.40
codegen_flags: <defaults>
</compile_context>

<pallas_src>
import functools

import jax
import jax.numpy as jnp
from jax import lax
from jax.experimental import pallas as pl
from jax.experimental.pallas import tpu as pltpu


def _round_up(x, m):
    return ((x + m - 1) // m) * m


def _prenorm_linear_kernel(x_ref, g_ref, bln_ref, w_ref, b_ref, o_ref, y_ref,
                           *, h_real, eps):
    j = pl.program_id(1)

    # ---- LayerNorm over the (real) last dim, f32, once per row tile ----
    @pl.when(j == 0)
    def _():
        x = x_ref[...].astype(jnp.float32)                  # (tm, H_pad)
        h_pad = x.shape[-1]

        # Padded lanes of x are zero, so the row sum is already correct.
        mean = jnp.sum(x, axis=-1, keepdims=True) * (1.0 / h_real)
        xc = x - mean
        if h_pad != h_real:
            lane = lax.broadcasted_iota(jnp.int32, (1, h_pad), 1)
            xc = jnp.where(lane < h_real, xc, 0.0)          # mask padded lanes
        var = jnp.sum(xc * xc, axis=-1, keepdims=True) * (1.0 / h_real)
        inv = lax.rsqrt(var + eps)                          # EUP
        y = xc * inv * g_ref[...] + bln_ref[...]            # padded lanes -> 0
        y_ref[...] = y.astype(jnp.bfloat16)

    # ---- fn = Linear(H, H): bf16 operands on the MXU, f32 accumulation ----
    out = jnp.dot(y_ref[...], w_ref[...], preferred_element_type=jnp.float32)
    out = out + b_ref[...]
    o_ref[...] = out.astype(o_ref.dtype)


def prenorm_linear(x2d, gamma, beta, w, b, *, eps=1e-5, tm=256):
    """x2d: (M, H) f32; gamma/beta/b: (H,); w: (H, H). Returns (M, H)."""
    M, H = x2d.shape
    H_pad = _round_up(max(H, 128), 128)          # lane-dense stores
    tm = min(tm, _round_up(M, 8))                # big row tiles, sublane-aligned
    M_pad = _round_up(M, tm)

    # Output-column tile: full H when small; otherwise a 128-multiple divisor.
    if H_pad <= 1024:
        tn = H_pad
    else:
        tn = 128
        for cand in (1024, 512, 256):
            if H_pad % cand == 0:
                tn = cand
                break

    # Zero-pad everything; padded lanes/rows are mathematically inert.
    xp = jnp.zeros((M_pad, H_pad), x2d.dtype).at[:M, :H].set(x2d)
    gp = jnp.zeros((1, H_pad), jnp.float32).at[0, :H].set(gamma.astype(jnp.float32))
    bnp = jnp.zeros((1, H_pad), jnp.float32).at[0, :H].set(beta.astype(jnp.float32))
    wp = jnp.zeros((H_pad, H_pad), jnp.bfloat16).at[:H, :H].set(w.astype(jnp.bfloat16))
    bp = jnp.zeros((1, H_pad), jnp.float32).at[0, :H].set(b.astype(jnp.float32))

    grid_m = M_pad // tm
    grid_n = H_pad // tn
    kernel = functools.partial(_prenorm_linear_kernel, h_real=H, eps=eps)

    out_p = pl.pallas_call(
        kernel,
        out_shape=jax.ShapeDtypeStruct((M_pad, H_pad), x2d.dtype),
        grid_spec=pltpu.PrefetchScalarGridSpec(
            num_scalar_prefetch=0,
            grid=(grid_m, grid_n),
            in_specs=[
                pl.BlockSpec((tm, H_pad), lambda i, j: (i, 0)),    # x rows (pipelined)
                pl.BlockSpec((1, H_pad), lambda i, j: (0, 0)),     # gamma (resident)
                pl.BlockSpec((1, H_pad), lambda i, j: (0, 0)),     # beta  (resident)
                pl.BlockSpec((H_pad, tn), lambda i, j: (0, j)),    # W column tile
                pl.BlockSpec((1, tn), lambda i, j: (0, j)),        # bias column tile
            ],
            out_specs=pl.BlockSpec((tm, tn), lambda i, j: (i, j)),
            scratch_shapes=[pltpu.VMEM((tm, H_pad), jnp.bfloat16)],  # LN(x) tile
        ),
        compiler_params=pltpu.CompilerParams(
            # Row tiles are independent -> megacore sharding on v7x.  The
            # column axis reuses the normalized-row scratch -> "arbitrary".
            dimension_semantics=("parallel", "arbitrary"),
        ),
        cost_estimate=pl.CostEstimate(
            flops=2 * M_pad * H_pad * H_pad,
            transcendentals=M_pad,
            bytes_accessed=(xp.size * 4 + grid_m * wp.size * 2 + M_pad * H_pad * 4),
        ),
    )(xp, gp, bnp, wp, bp)
    return out_p[:M, :H]


def prenorm_forward(x, gamma, beta, w, b, eps=1e-5):
    """x: (B, S, H).  Returns fn(LayerNorm(x)) with fn = Linear(H, H)."""
    B, S, H = x.shape
    out2d = prenorm_linear(x.reshape(B * S, H), gamma, beta, w, b, eps=eps)
    return out2d.reshape(B, S, H)


if __name__ == "__main__":
    key = jax.random.PRNGKey(0)
    kx, kg, kbn, kw, kb = jax.random.split(key, 5)

    B, S, H = 2, 8, 32            # batch=2, seq=8, hidden=32
    x = jax.random.normal(kx, (B, S, H), dtype=jnp.float32)

    # LayerNorm affine params (deterministic, non-trivial).
    gamma = 1.0 + 0.1 * jax.random.normal(kg, (H,), dtype=jnp.float32)
    beta = 0.1 * jax.random.normal(kbn, (H,), dtype=jnp.float32)

    # fn = Linear(H, H), PyTorch-style uniform init.
    bound = 1.0 / (H ** 0.5)
    w = jax.random.uniform(kw, (H, H), minval=-bound, maxval=bound,
                           dtype=jnp.float32)
    b = jax.random.uniform(kb, (H,), minval=-bound, maxval=bound,
                           dtype=jnp.float32)

    out = prenorm_forward(x, gamma, beta, w, b)
    out = jax.block_until_ready(out)

    # Plain-JAX reference: Linear(LayerNorm(x)) in f32.
    mean = x.mean(-1, keepdims=True)
    var = ((x - mean) ** 2).mean(-1, keepdims=True)
    y_ref = (x - mean) / jnp.sqrt(var + 1e-5) * gamma + beta
    ref = jnp.einsum("bsh,hk->bsk", y_ref, w) + b

    assert out.shape == (B, S, H)
    # Loose tolerance: kernel uses bf16 matmul operands (f32 accumulation).
    assert jnp.allclose(out, ref, atol=2e-2, rtol=2e-2)

    print("KERNEL_OK")
</pallas_src>

<mosaic_0001>
module attributes {stable_mosaic.version = 11 : i64} {
  func.func @_prenorm_linear_kernel(%arg0: i32, %arg1: i32, %arg2: memref<16x128xf32, #tpu.memory_space<vmem>>, %arg3: memref<1x128xf32, #tpu.memory_space<vmem>>, %arg4: memref<1x128xf32, #tpu.memory_space<vmem>>, %arg5: memref<128x128xbf16, #tpu.memory_space<vmem>>, %arg6: memref<1x128xf32, #tpu.memory_space<vmem>>, %arg7: memref<16x128xf32, #tpu.memory_space<vmem>>, %arg8: memref<16x128xbf16, #tpu.memory_space<vmem>>) attributes {dimension_semantics = [#tpu.dimension_semantics<parallel>, #tpu.dimension_semantics<arbitrary>], iteration_bounds = array<i64: 1, 1>, scalar_prefetch = 0 : i64, scratch_operands = 1 : i64, tpu.core_type = #tpu.core_type<tc>, window_params = [{transform_indices = @transform_0, window_bounds = array<i64: 16, 128>}, {pipeline_mode = #tpu.pipeline_mode<synchronous>, transform_indices = @transform_1, window_bounds = array<i64: 1, 128>}, {pipeline_mode = #tpu.pipeline_mode<synchronous>, transform_indices = @transform_2, window_bounds = array<i64: 1, 128>}, {transform_indices = @transform_3, window_bounds = array<i64: 128, 128>}, {transform_indices = @transform_4, window_bounds = array<i64: 1, 128>}, {transform_indices = @transform_5, window_bounds = array<i64: 16, 128>}]} {
    %c0_i32 = arith.constant 0 : i32
    %0 = arith.cmpi eq, %arg1, %c0_i32 : i32
    %1 = arith.extui %0 : i1 to i32
    %c0_i32_0 = arith.constant 0 : i32
    %2 = arith.cmpi ne, %1, %c0_i32_0 : i32
    scf.if %2 {
      %c0_8 = arith.constant 0 : index
      %c0_9 = arith.constant 0 : index
      %10 = vector.load %arg2[%c0_8, %c0_9] : memref<16x128xf32, #tpu.memory_space<vmem>>, vector<16x128xf32>
      %cst_10 = arith.constant dense<0.000000e+00> : vector<16xf32>
      %11 = vector.multi_reduction <add>, %10, %cst_10 [1] : vector<16x128xf32> to vector<16xf32>
      %12 = vector.shape_cast %11 : vector<16xf32> to vector<16x1xf32>
      %cst_11 = arith.constant 3.125000e-02 : f32
      %13 = vector.broadcast %cst_11 : f32 to vector<16x1xf32>
      %14 = arith.mulf %12, %13 : vector<16x1xf32>
      %15 = vector.broadcast %14 : vector<16x1xf32> to vector<16x128xf32>
      %16 = arith.subf %10, %15 : vector<16x128xf32>
      %17 = tpu.iota {dimensions = array<i32: 1>} : vector<1x128xi32>
      %c32_i32 = arith.constant 32 : i32
      %18 = vector.broadcast %c32_i32 : i32 to vector<1x128xi32>
      %19 = arith.cmpi slt, %17, %18 : vector<1x128xi32>
      %cst_12 = arith.constant 0.000000e+00 : f32
      %20 = vector.shape_cast %19 : vector<1x128xi1> to vector<1x128xi1>
      %21 = vector.broadcast %20 : vector<1x128xi1> to vector<16x128xi1>
      %22 = vector.broadcast %cst_12 : f32 to vector<16x128xf32>
      %23 = arith.select %21, %16, %22 : vector<16x128xi1>, vector<16x128xf32>
      %24 = arith.mulf %23, %23 : vector<16x128xf32>
      %cst_13 = arith.constant dense<0.000000e+00> : vector<16xf32>
      %25 = vector.multi_reduction <add>, %24, %cst_13 [1] : vector<16x128xf32> to vector<16xf32>
      %26 = vector.shape_cast %25 : vector<16xf32> to vector<16x1xf32>
      %cst_14 = arith.constant 3.125000e-02 : f32
      %27 = vector.broadcast %cst_14 : f32 to vector<16x1xf32>
      %28 = arith.mulf %26, %27 : vector<16x1xf32>
      %cst_15 = arith.constant 9.99999974E-6 : f32
      %29 = vector.broadcast %cst_15 : f32 to vector<16x1xf32>
      %30 = arith.addf %28, %29 : vector<16x1xf32>
      %31 = math.rsqrt %30 : vector<16x1xf32>
      %32 = vector.broadcast %31 : vector<16x1xf32> to vector<16x128xf32>
      %33 = arith.mulf %23, %32 : vector<16x128xf32>
      %c0_16 = arith.constant 0 : index
      %c0_17 = arith.constant 0 : index
      %34 = vector.load %arg3[%c0_16, %c0_17] : memref<1x128xf32, #tpu.memory_space<vmem>>, vector<1x128xf32>
      %35 = vector.broadcast %34 : vector<1x128xf32> to vector<16x128xf32>
      %36 = arith.mulf %33, %35 : vector<16x128xf32>
      %c0_18 = arith.constant 0 : index
      %c0_19 = arith.constant 0 : index
      %37 = vector.load %arg4[%c0_18, %c0_19] : memref<1x128xf32, #tpu.memory_space<vmem>>, vector<1x128xf32>
      %38 = vector.broadcast %37 : vector<1x128xf32> to vector<16x128xf32>
      %39 = arith.addf %36, %38 : vector<16x128xf32>
      %40 = arith.truncf %39 : vector<16x128xf32> to vector<16x128xbf16>
      %c0_20 = arith.constant 0 : index
      %c0_21 = arith.constant 0 : index
      %41 = vector.load %arg8[%c0_20, %c0_21] : memref<16x128xbf16, #tpu.memory_space<vmem>>, vector<16x128xbf16>
      tpu.vector_store %arg8[%c0_20, %c0_21], %40 {strides = array<i32>} : memref<16x128xbf16, #tpu.memory_space<vmem>>, vector<16x128xbf16>,
    } else {
    }
    %c0 = arith.constant 0 : index
    %c0_1 = arith.constant 0 : index
    %3 = vector.load %arg8[%c0, %c0_1] : memref<16x128xbf16, #tpu.memory_space<vmem>>, vector<16x128xbf16>
    %c0_2 = arith.constant 0 : index
    %c0_3 = arith.constant 0 : index
    %4 = vector.load %arg5[%c0_2, %c0_3] : memref<128x128xbf16, #tpu.memory_space<vmem>>, vector<128x128xbf16>
    %cst = arith.constant dense<0.000000e+00> : vector<16x128xf32>
    %5 = tpu.matmul %3, %4, %cst {dimension_numbers = #tpu.dot_dimension_numbers<[1], [0], [0], [1], [0, 0, 1, 1], [], []>} : vector<16x128xbf16>, vector<128x128xbf16>, vector<16x128xf32> -> vector<16x128xf32>
    %c0_4 = arith.constant 0 : index
    %c0_5 = arith.constant 0 : index
    %6 = vector.load %arg6[%c0_4, %c0_5] : memref<1x128xf32, #tpu.memory_space<vmem>>, vector<1x128xf32>
    %7 = vector.broadcast %6 : vector<1x128xf32> to vector<16x128xf32>
    %8 = arith.addf %5, %7 : vector<16x128xf32>
    %c0_6 = arith.constant 0 : index
    %c0_7 = arith.constant 0 : index
    %9 = vector.load %arg7[%c0_6, %c0_7] : memref<16x128xf32, #tpu.memory_space<vmem>>, vector<16x128xf32>
    tpu.vector_store %arg7[%c0_6, %c0_7], %8 {strides = array<i32>} : memref<16x128xf32, #tpu.memory_space<vmem>>, vector<16x128xf32>,
    return
  }
  func.func @transform_0(%arg0: i32, %arg1: i32) -> (i32, i32) {
    %c0_i32 = arith.constant 0 : i32
    %c0_i32_0 = arith.constant 0 : i32
    return %arg0, %c0_i32 : i32, i32
  }
  func.func @transform_1(%arg0: i32, %arg1: i32) -> (i32, i32) {
    %c0_i32 = arith.constant 0 : i32
    %c0_i32_0 = arith.constant 0 : i32
    %c0_i32_1 = arith.constant 0 : i32
    return %c0_i32, %c0_i32_0 : i32, i32
  }
  func.func @transform_2(%arg0: i32, %arg1: i32) -> (i32, i32) {
    %c0_i32 = arith.constant 0 : i32
    %c0_i32_0 = arith.constant 0 : i32
    %c0_i32_1 = arith.constant 0 : i32
    return %c0_i32, %c0_i32_0 : i32, i32
  }
  func.func @transform_3(%arg0: i32, %arg1: i32) -> (i32, i32) {
    %c0_i32 = arith.constant 0 : i32
    %c0_i32_0 = arith.constant 0 : i32
    return %c0_i32, %arg1 : i32, i32
  }
  func.func @transform_4(%arg0: i32, %arg1: i32) -> (i32, i32) {
    %c0_i32 = arith.constant 0 : i32
    %c0_i32_0 = arith.constant 0 : i32
    return %c0_i32, %arg1 : i32, i32
  }
  func.func @transform_5(%arg0: i32, %arg1: i32) -> (i32, i32) {
    %c0_i32 = arith.constant 0 : i32
    return %arg0, %arg1 : i32, i32
  }
}

</mosaic_0001>

<bundles_post_ra>
// kernel: tpu_custom_call.1
= control target key start
LH: loop header
LB: loop body
LE: loop exit
PB: predicated region body
PF: predicated region fallthrough
CT: control target
= control target key end

     0   :  { %10 = vsyncpa [#allocation4], 0  ;;  %s454_s0 = inlined_call_operand.hbm [shape: f32[16,128], index: 0, kind: input, shape index: {}]   ;;  %s455_s1 = inlined_call_operand.vmem [shape: f32[1,128], index: 1, kind: input, shape index: {}]   ;;  %s456_s2 = inlined_call_operand.vmem [shape: f32[1,128], index: 2, kind: input, shape index: {}]   ;;  %s457_s3 = inlined_call_operand.hbm [shape: bf16[128,128], index: 3, kind: input, shape index: {}]   ;;  %s458_s4 = inlined_call_operand.vmem [shape: f32[1,128], index: 4, kind: input, shape index: {}]   ;;  %s459_s5 = inlined_call_operand.hbm [shape: f32[16,128], index: 5, kind: output, shape index: {}]  }
   0x1   :  { %11 = vsyncpa [#allocation7], 0 }
   0x2   :  { %12 = vsyncpa [#allocation5], 0  ;;  %s391_s18 = smov [#allocation3]  }
   0x3   :  { %s18_s19 = sshll.u32 %s391_s18, 4  ;;  %s19_s19 = int_to_ptr.vmem [resolvable:$true] %s18_s19 }
   0x4   :  { %s333_s20 = scalar_lea.vmem %s19_s19, 256  ;;  %p338_p1 = scmp.lt.s32.totalorder %s19_s19, %s19_s19 }
   0x5   :  { %p334_p0 = scmp.ne.s32.totalorder %s19_s19, %s333_s20  ;;  %p339_p2 = scmp.lt.s32.totalorder %s333_s20, %s333_s20 }
   0x7   :  { %p340_p3 = por %p339_p2, %p338_p1 }
   0x9   :  { %p341_p4 = pnand %p340_p3, %p334_p0 }
   0xb   :  { %344 = shalt.err (!%p341_p4)
}
   0xc   :  { %s392_s21 = smov 128   ;;  %s393_s22 = smov 8  }
   0xd   :  { %24 = dma.hbm_to_vmem [thread:$0]  %s454_s0, 256, %s19_s19, [#allocation4], %s392_s21, %s392_s21, %s393_s22  }
   0xe   :  { %s394_s25 = smov [#allocation6]  }
   0xf   :  { %s34_s26 = sshll.u32 %s394_s25, 4  ;;  %s35_s26 = int_to_ptr.vmem [resolvable:$true] %s34_s26 }
  0x10   :  { %s353_s27 = scalar_lea.vmem %s35_s26, 1024  ;;  %p358_p6 = scmp.lt.s32.totalorder %s35_s26, %s35_s26 }
  0x11   :  { %p354_p5 = scmp.ne.s32.totalorder %s35_s26, %s353_s27  ;;  %p359_p7 = scmp.lt.s32.totalorder %s353_s27, %s353_s27 }
  0x13   :  { %p360_p8 = por %p359_p7, %p358_p6 }
  0x15   :  { %p361_p9 = pnand %p360_p8, %p354_p5 }
  0x17   :  { %364 = shalt.err (!%p361_p9)
}
  0x18   :  { %s395_s28 = smov 64   ;;  %s396_s29 = smov 4  }
  0x19   :  { %40 = dma.hbm_to_vmem [thread:$0]  %s457_s3, 1024, %s35_s26, [#allocation7], %s395_s28, %s395_s28, %s396_s29  }
  0x1a   :  { %385 = dma.done.wait [#allocation4], 256  }
  0x1b   :  { %386 = vsyncadd [#allocation4], 4294967040 }
  0x1c   :  { %387 = dma.done.wait [#allocation7], 1024  }
  0x1d   :  { %388 = vsyncadd [#allocation7], 4294966272  ;;  %v54_v0 = vld [vmem:[#allocation3] sm:$0xff]  ;;  %v55_v1 = vld [vmem:[#allocation3 + $0x8] sm:$0xff]  ;;  %v64_v2 = vlaneseq  ;;  %v397_v15 = vmov 0.0   ;;  %vm398_vm1 = vmmov 0  }
  0x1e   :  { %56 = vadd.xlane.f32.xlu0 %v54_v0  ;;  %v312_v14 = vld [vmem:[#allocation6 + $0x38] sm:$0xff]   ;;  %283 = vmatprep.subr.bf16.mxu0 %v397_v15  ;;  %v313_v16 = vld [vmem:[#allocation6 + $0x30] sm:$0xff]   ;;  %v314_v17 = vld [vmem:[#allocation6 + $0x28] sm:$0xff]  }
  0x1f   :  { %v65_v3 = vand.u32 127, %v64_v2  ;;  %284 = vmatpush3.bf16.msra.mxu0 %v312_v14  ;;  %v315_v18 = vld [vmem:[#allocation6 + $0x20] sm:$0xff]   ;;  %v316_v19 = vld [vmem:[#allocation6 + $0x18] sm:$0xff]   ;;  %v317_v20 = vld [vmem:[#allocation6 + $0x10] sm:$0xff]   ;;  %299 = vmatprep.mubr.msk.bf16.mxu0 %vm398_vm1, %v397_v15 }
  0x20   :  { %285 = vmatprep.subr.bf16.mxu0 %v397_v15  ;;  %v318_v21 = vld [vmem:[#allocation6 + $0x8] sm:$0xff]   ;;  %v319_v22 = vld [vmem:[#allocation6] sm:$0xff]  }
  0x21   :  { %vm66_vm0 = vcmp.lt.s32.totalorder %v65_v3, 32  ;;  %v253_v31 = vld [vmem:[%s455_s1] ss:$0 sm:$0xff]  ;;  %s399_s1 = smov [#allocation8]  }
  0x22   :  { %58 = vadd.xlane.f32.xlu0 %v55_v1  ;;  %v254_v35 = vld [vmem:[%s456_s2] ss:$0 sm:$0xff]  ;;  %s240_s11 = sshll.u32 %s399_s1, 4  ;;  %s241_s11 = int_to_ptr.vmem [resolvable:$true] %s240_s11 }
  0x23   :  { %286 = vmatpush3.bf16.msra.mxu0 %v313_v16  ;;  %v257_v41 = vld [vmem:[%s458_s4] ss:$0 sm:$0xff]  ;;  %s365_s2 = scalar_lea.vmem %s241_s11, 256  ;;  %p370_p11 = scmp.lt.s32.totalorder %s241_s11, %s241_s11 }
  0x24   :  { %287 = vmatprep.subr.bf16.mxu0 %v397_v15  ;;  %p366_p10 = scmp.ne.s32.totalorder %s241_s11, %s365_s2  ;;  %p371_p12 = scmp.lt.s32.totalorder %s365_s2, %s365_s2 }
  0x26   :  { %p372_p13 = por %p371_p12, %p370_p11 }
  0x27   :  { %288 = vmatpush3.bf16.msra.mxu0 %v314_v17 }
  0x28   :  { %289 = vmatprep.subr.bf16.mxu0 %v397_v15  ;;  %p373_p0 = pnand %p372_p13, %p366_p10 }
  0x2b   :  { %290 = vmatpush3.bf16.msra.mxu0 %v315_v18 }
  0x2c   :  { %291 = vmatprep.subr.bf16.mxu0 %v397_v15 }
  0x2f   :  { %292 = vmatpush3.bf16.msra.mxu0 %v316_v19 }
  0x30   :  { %293 = vmatprep.subr.bf16.mxu0 %v397_v15 }
  0x33   :  { %294 = vmatpush3.bf16.msra.mxu0 %v317_v20 }
  0x34   :  { %295 = vmatprep.subr.bf16.mxu0 %v397_v15 }
  0x37   :  { %296 = vmatpush3.bf16.msra.mxu0 %v318_v21 }
  0x38   :  { %297 = vmatprep.subr.bf16.mxu0 %v397_v15 }
  0x3b   :  { %298 = vmatpush3.bf16.msra.mxu0 %v319_v22 }
  0xa7   :  { %v57_v4 = vpop.xlane.xlu0 %56 }
  0xa8   :  { %v60_v5 = vmul.f32 0.03125, %v57_v4 }
  0xaa   :  { %v62_v6 = vsub.f32 %v54_v0, %v60_v5 }
  0xab   :  { %v59_v7 = vpop.xlane.xlu0 %58 }
  0xac   :  { %v61_v8 = vmul.f32 0.03125, %v59_v7  ;;  %v69_v9 = vsel %vm66_vm0, %v62_v6, 0.0 }
  0xad   :  { %v71_v10 = vmul.f32 %v69_v9, %v69_v9 }
  0xae   :  { %v63_v11 = vsub.f32 %v55_v1, %v61_v8 }
  0xaf   :  { %73 = vadd.xlane.f32.xlu1 %v71_v10 }
  0xb0   :  { %v70_v12 = vsel %vm66_vm0, %v63_v11, 0.0 }
  0xb1   :  { %v72_v13 = vmul.f32 %v70_v12, %v70_v12 }
  0xb3   :  { %75 = vadd.xlane.f32.xlu1 %v72_v13 }
 0x138   :  { %v74_v23 = vpop.xlane.xlu1 %73 }
 0x139   :  { %v77_v24 = vmul.f32 0.03125, %v74_v23 }
 0x13b   :  { %v79_v25 = vadd.f32 1e-05, %v77_v24 }
 0x13c   :  { %v76_v26 = vpop.xlane.xlu1 %75 }
 0x13d   :  { %321 = vrsqrt.f32 %v79_v25  ;;  %v78_v27 = vmul.f32 0.03125, %v76_v26 }
 0x13f   :  { %v80_v28 = vadd.f32 1e-05, %v78_v27 }
 0x141   :  { %323 = vrsqrt.f32 %v80_v28 }
 0x14a   :  { %v322_v29 = vpop.eup %321 }
 0x14b   :  { %v83_v30 = vmul.f32 %v322_v29, %v69_v9 }
 0x14d   :  { %v92_v33 = vmul.f32 %v253_v31, %v83_v30 }
 0x14e   :  { %v324_v32 = vpop.eup %323 }
 0x14f   :  { %v84_v34 = vmul.f32 %v324_v32, %v70_v12  ;;  %v101_v37 = vadd.f32 %v254_v35, %v92_v33 }
 0x151   :  { %v93_v36 = vmul.f32 %v253_v31, %v84_v34 }
 0x153   :  { %v102_v38 = vadd.f32 %v254_v35, %v93_v36 }
 0x155   :  { %v272_v39 = vpack.c.bf16 %v102_v38, %v101_v37 }
 0x157   :  { %273 = vst [vmem:[#allocation2] sm:$0xff] %v272_v39  }
 0x15e   :  { %v320_v40 = vld [vmem:[#allocation2] sm:$0xff]  }
 0x15f   :  { %300 = vmatmul.mubr.bf16.vlgmr.msra.gmra.mxu0 %v320_v40 }
 0x21f   :  { %v226_v42 = vpop.f32.mrf.mxu0 }
 0x220   :  { %v227_v43 = vadd.f32 %v257_v41, %v226_v42 }
 0x221   :  { %v301_v44 = vpop.f32.mrf.mxu0 }
 0x222   :  { %233 = vst [vmem:[#allocation8] sm:$0xff] %v227_v43 }
 0x223   :  { %v229_v45 = vpop.f32.mrf.mxu0 }
 0x224   :  { %v230_v46 = vadd.f32 %v257_v41, %v229_v45 }
 0x225   :  { %v302_v47 = vpop.f32.mrf.mxu0 }
 0x226   :  { %234 = vst [vmem:[#allocation8 + $0x8] sm:$0xff] %v230_v46 }
 0x227   :  { %376 = shalt.err (!%p373_p0)
}
 0x228   :  { %246 = dma.vmem_to_hbm [thread:$0]  %s241_s11, 256, %s459_s5, [#allocation5], %s392_s21, %s392_s21, %s393_s22  }
 0x229   :  { %389 = dma.done.wait [#allocation5], 256  }
 0x22a   :  { %390 = vsyncadd [#allocation5], 4294967040 }
 0x22b   :  { %250 = vsyncpa [#allocation4], 1 }
 0x22c   :  { %251 = vsyncpa [#allocation7], 1 }
 0x22d   :  { %252 = vsyncpa [#allocation5], 1 }

</bundles_post_ra>
